<compile_context>
chip_gen: v5e
topology: v5e:2x2
jax: 0.10.0
libtpu: 0.0.40
codegen_flags: <defaults>
</compile_context>

<pallas_src>
import jax
import jax.numpy as jnp
from jax.experimental import pallas as pl
from jax.experimental.pallas import tpu as pltpu

_LANE = 128


def _round_up(x, m):
    return ((x + m - 1) // m) * m


def _vmem_capacity_bytes():
    """Physical VMEM per TensorCore; conservative fallback if the query fails."""
    try:
        return int(pltpu.get_tpu_info().vmem_capacity_bytes)
    except Exception:
        return 64 * 1024 * 1024  # v7x per-TC size == safest assumption


# ---------------------------------------------------------------------------
# Kernels
# ---------------------------------------------------------------------------
def _linear_relu_small_kernel(x_ref, w_ref, b_ref, o_ref):
    """1-D grid over M; the full (padded) W and bias stay resident in VMEM."""
    acc = jnp.dot(x_ref[...], w_ref[...], preferred_element_type=jnp.float32)
    o_ref[...] = jnp.maximum(acc + b_ref[...], 0.0).astype(o_ref.dtype)


def _linear_relu_accout_kernel(x_ref, w_ref, b_ref, o_ref):
    """3-D grid (M,N,K); the f32 output block itself is the accumulator."""
    k = pl.program_id(2)

    @pl.when(k == 0)
    def _():
        o_ref[...] = jnp.zeros_like(o_ref)

    o_ref[...] += jnp.dot(x_ref[...], w_ref[...],
                          preferred_element_type=jnp.float32)

    @pl.when(k == pl.num_programs(2) - 1)
    def _():
        o_ref[...] = jnp.maximum(o_ref[...] + b_ref[...], 0.0)


def _linear_relu_scratch_kernel(x_ref, w_ref, b_ref, o_ref, acc_ref):
    """3-D grid; f32 scratch accumulator (used when out_dtype != float32)."""
    k = pl.program_id(2)

    @pl.when(k == 0)
    def _():
        acc_ref[...] = jnp.zeros_like(acc_ref)

    acc_ref[...] += jnp.dot(x_ref[...], w_ref[...],
                            preferred_element_type=jnp.float32)

    @pl.when(k == pl.num_programs(2) - 1)
    def _():
        o_ref[...] = jnp.maximum(acc_ref[...] + b_ref[...], 0.0).astype(o_ref.dtype)


# ---------------------------------------------------------------------------
# Wrapper
# ---------------------------------------------------------------------------
def prepare_aggregator_weights(w, b, *, compute_dtype=jnp.float32):
    """Cast + lane-pad the weights ONCE (reuse across calls to skip the per-call
    cast/pad HBM pass).  Pass results to aggregator_forward together with
    out_features=<original output_dim>."""
    K, N = w.shape
    K_pad = _round_up(K, _LANE)
    N_pad = _round_up(N, _LANE)
    wp = jnp.pad(w.astype(compute_dtype), ((0, K_pad - K), (0, N_pad - N)))
    bp = jnp.pad(jnp.asarray(b, jnp.float32).reshape(1, -1),
                 ((0, 0), (0, N_pad - N)))
    return wp, bp


def aggregator_forward(x, w, b, *,
                       tm=None, tn=None, tk=None,
                       compute_dtype=jnp.float32,
                       out_dtype=None,
                       out_features=None,
                       allow_resident_w_fastpath=True,
                       use_pallas=True):
    """relu(x @ w + b) via tiled Pallas TPU kernels.

    x: (M, K) activations
    w: (K, N) weight (torch (out,in) transposed), possibly pre-padded to lanes
    b: (N,) or (1, N) bias
    out_features: logical N when w/b were pre-padded via prepare_aggregator_weights.
    """
    M, K = x.shape
    Kw, Nw = w.shape
    assert Kw >= K, "weight K dim must be >= activation K dim"
    N = Nw if out_features is None else out_features
    assert N <= Nw
    out_dtype = x.dtype if out_dtype is None else out_dtype
    out_bytes = jnp.dtype(out_dtype).itemsize
    in_bytes = jnp.dtype(compute_dtype).itemsize
    # bf16 packs 2 rows per sublane -> keep M-blocks a multiple of 16 for bf16.
    sublane = 8 if in_bytes >= 4 else (16 if in_bytes == 2 else 32)

    if not use_pallas:
        out = jnp.maximum(
            jnp.dot(x.astype(compute_dtype), w.astype(compute_dtype),
                    preferred_element_type=jnp.float32)
            + jnp.asarray(b, jnp.float32).reshape(1, -1), 0.0)
        return out[:, :N].astype(out_dtype)

    vmem_cap = _vmem_capacity_bytes()
    vmem_budget = int(0.85 * vmem_cap)   # headroom for Mosaic internal scratch

    # No-ops when weights were pre-prepared with prepare_aggregator_weights().
    xd = x.astype(compute_dtype)
    wd = w.astype(compute_dtype)
    bf = jnp.asarray(b, jnp.float32).reshape(1, -1)
    assert bf.shape[1] == Nw

    K_lane = _round_up(Kw, _LANE)
    N_lane = _round_up(Nw, _LANE)

    # ------------- fast path: whole W resident in VMEM, 1-D grid over M ------
    w_bytes = K_lane * N_lane * in_bytes
    if allow_resident_w_fastpath and w_bytes <= min(6 << 20, vmem_budget // 8):
        tm_f = min(1024, _round_up(M, sublane))

        def _fp(tm_):
            return (2 * tm_ * K_lane * in_bytes       # x (double-buffered)
                    + 2 * w_bytes                     # W (allocated 2x, DMA'd once)
                    + 2 * N_lane * 4                  # bias
                    + 2 * tm_ * N_lane * out_bytes)   # out (double-buffered)

        while tm_f > sublane and _fp(tm_f) > vmem_budget:
            tm_f = max(sublane, _round_up(tm_f // 2, sublane))

        M_pad = _round_up(M, tm_f)
        if (M_pad, K_lane) != (M, K):
            xd = jnp.pad(xd, ((0, M_pad - M), (0, K_lane - K)))
        if (K_lane, N_lane) != (Kw, Nw):
            wd = jnp.pad(wd, ((0, K_lane - Kw), (0, N_lane - Nw)))
        if N_lane != Nw:
            bf = jnp.pad(bf, ((0, 0), (0, N_lane - Nw)))

        out = pl.pallas_call(
            _linear_relu_small_kernel,
            out_shape=jax.ShapeDtypeStruct((M_pad, N_lane), out_dtype),
            grid_spec=pltpu.PrefetchScalarGridSpec(
                num_scalar_prefetch=0,
                grid=(M_pad // tm_f,),
                in_specs=[
                    pl.BlockSpec((tm_f, K_lane), lambda i: (i, 0)),     # x stream
                    pl.BlockSpec((K_lane, N_lane), lambda i: (0, 0)),   # W resident
                    pl.BlockSpec((1, N_lane), lambda i: (0, 0)),        # bias
                ],
                out_specs=pl.BlockSpec((tm_f, N_lane), lambda i: (i, 0)),
            ),
            compiler_params=pltpu.CompilerParams(
                dimension_semantics=("parallel",),
                vmem_limit_bytes=int(min(vmem_budget,
                                         max(2 * _fp(tm_f), 16 << 20))),
            ),
            cost_estimate=pl.CostEstimate(
                flops=2 * M_pad * K_lane * N_lane,
                bytes_accessed=(M_pad * K_lane * in_bytes + w_bytes
                                + N_lane * 4 + M_pad * N_lane * out_bytes),
                transcendentals=0,
            ),
        )(xd, wd, bf)
        return out[:M, :N]

    # ------------- general path: 3-D (M, N, K) reduction grid ----------------
    if tm is None or tn is None or tk is None:
        # >=100 MiB VMEM (v5e/v6e) -> 1024x1024 output tiles (higher arithmetic
        # intensity); 64 MiB per-TC (v7x) -> 512x512 with headroom.
        big_vmem = vmem_cap >= (100 << 20)
        tm = (1024 if big_vmem else 512) if tm is None else tm
        tn = (1024 if big_vmem else 512) if tn is None else tn
        tk = 1024 if tk is None else tk

    tm_eff = max(sublane, min(_round_up(tm, sublane), _round_up(M, sublane)))
    tn_eff = max(_LANE, min(_round_up(tn, _LANE), N_lane))
    tk_eff = max(_LANE, min(_round_up(tk, _LANE), K_lane))

    def _footprint(tm_, tn_, tk_):
        f = (2 * (tm_ * tk_ + tk_ * tn_) * in_bytes   # x + w (double-buffered)
             + 2 * tn_ * 4                            # bias
             + 2 * tm_ * tn_ * out_bytes)             # output (double-buffered)
        if jnp.dtype(out_dtype) != jnp.dtype(jnp.float32):
            f += tm_ * tn_ * 4                        # f32 scratch accumulator
        return f

    # Shrink tiles (keeping hardware granularity) until they fit the budget.
    for _ in range(16):
        if _footprint(tm_eff, tn_eff, tk_eff) <= vmem_budget:
            break
        if tk_eff > _LANE and tk_eff >= max(tm_eff, tn_eff):
            tk_eff = max(_LANE, _round_up(tk_eff // 2, _LANE))
        elif tn_eff > _LANE and tn_eff >= tm_eff:
            tn_eff = max(_LANE, _round_up(tn_eff // 2, _LANE))
        elif tm_eff > sublane:
            tm_eff = max(sublane, _round_up(tm_eff // 2, sublane))
        else:
            break

    M_pad = _round_up(M, tm_eff)
    N_pad = _round_up(N_lane, tn_eff)
    K_pad = _round_up(K_lane, tk_eff)

    if (M_pad, K_pad) != (M, K):
        xd = jnp.pad(xd, ((0, M_pad - M), (0, K_pad - K)))
    if (K_pad, N_pad) != (Kw, Nw):
        wd = jnp.pad(wd, ((0, K_pad - Kw), (0, N_pad - Nw)))
    if N_pad != Nw:
        bf = jnp.pad(bf, ((0, 0), (0, N_pad - Nw)))

    grid_m, grid_n, grid_k = M_pad // tm_eff, N_pad // tn_eff, K_pad // tk_eff

    acc_into_out = jnp.dtype(out_dtype) == jnp.dtype(jnp.float32)
    kernel = _linear_relu_accout_kernel if acc_into_out else _linear_relu_scratch_kernel
    scratch = [] if acc_into_out else [pltpu.VMEM((tm_eff, tn_eff), jnp.float32)]

    out = pl.pallas_call(
        kernel,
        out_shape=jax.ShapeDtypeStruct((M_pad, N_pad), out_dtype),
        grid_spec=pltpu.PrefetchScalarGridSpec(
            num_scalar_prefetch=0,
            grid=(grid_m, grid_n, grid_k),
            in_specs=[
                pl.BlockSpec((tm_eff, tk_eff), lambda i, j, k: (i, k)),   # x tile
                pl.BlockSpec((tk_eff, tn_eff), lambda i, j, k: (k, j)),   # w tile
                pl.BlockSpec((1, tn_eff), lambda i, j, k: (0, j)),        # bias row
            ],
            out_specs=pl.BlockSpec((tm_eff, tn_eff), lambda i, j, k: (i, j)),
            scratch_shapes=scratch,
        ),
        compiler_params=pltpu.CompilerParams(
            dimension_semantics=("parallel", "parallel", "arbitrary"),
            vmem_limit_bytes=int(min(vmem_budget,
                                     max(2 * _footprint(tm_eff, tn_eff, tk_eff),
                                         16 << 20))),
        ),
        cost_estimate=pl.CostEstimate(
            flops=2 * M_pad * K_pad * N_pad,
            # Account for re-reads: x streamed once per N-tile, w once per M-tile.
            bytes_accessed=(M_pad * K_pad * in_bytes * grid_n
                            + K_pad * N_pad * in_bytes * grid_m
                            + N_pad * 4 * grid_m
                            + M_pad * N_pad * out_bytes),
            transcendentals=0,
        ),
    )(xd, wd, bf)

    return out[:M, :N]


# ---------------------------------------------------------------------------
# Reference / init / demo
# ---------------------------------------------------------------------------
def init_aggregator_params(key, input_dim, output_dim):
    """Mirror nn.Linear default init: uniform in +/- 1/sqrt(fan_in)."""
    kw, kb = jax.random.split(key)
    bound = 1.0 / jnp.sqrt(jnp.float32(input_dim))
    w = jax.random.uniform(kw, (input_dim, output_dim), jnp.float32, -bound, bound)
    b = jax.random.uniform(kb, (output_dim,), jnp.float32, -bound, bound)
    return w, b


def _reference(x, w, b):
    return jnp.maximum(
        jnp.dot(x, w, precision=jax.lax.Precision.HIGHEST)
        + jnp.asarray(b).reshape(1, -1), 0.0)


if __name__ == "__main__":
    key = jax.random.PRNGKey(0)
    k_x, k_p, k_x2, k_p2 = jax.random.split(key, 4)

    # 1) Small shape consistent with the module (batch=8, in=32, out=16).
    #    Small K/N -> resident-W fast path, exact f32.
    batch, input_dim, output_dim = 8, 32, 16
    x = jax.random.normal(k_x, (batch, input_dim), jnp.float32)
    w, b = init_aggregator_params(k_p, input_dim, output_dim)
    out = jax.block_until_ready(aggregator_forward(x, w, b))
    ref = _reference(x, w, b)
    assert out.shape == (batch, output_dim)
    assert jnp.allclose(out, ref, atol=1e-3, rtol=1e-3), "fast-path f32 mismatch"

    # 2) Medium shape exercising the 3-D reduction grid (f32 output accumulates
    #    directly into the resident output block); small tiles force >1 grid
    #    step per axis and padding on every dim.
    M2, K2, N2 = 256, 640, 384
    x2 = jax.random.normal(k_x2, (M2, K2), jnp.float32)
    w2, b2 = init_aggregator_params(k_p2, K2, N2)
    out2 = jax.block_until_ready(
        aggregator_forward(x2, w2, b2, tm=128, tn=128, tk=256,
                           allow_resident_w_fastpath=False))
    ref2 = _reference(x2, w2, b2)
    assert out2.shape == (M2, N2)
    assert jnp.allclose(out2, ref2, atol=2e-2, rtol=2e-2), "general-path f32 mismatch"

    # 3) bf16 compute + bf16 output + pre-prepared (cast+padded) weights
    #    -> scratch-accumulator kernel, halved HBM traffic; weights cast once.
    wp, bp = prepare_aggregator_weights(w2, b2, compute_dtype=jnp.bfloat16)
    out3 = jax.block_until_ready(
        aggregator_forward(x2, wp, bp, out_features=N2,
                           compute_dtype=jnp.bfloat16, out_dtype=jnp.bfloat16,
                           tm=128, tn=128, tk=256,
                           allow_resident_w_fastpath=False))
    assert out3.shape == (M2, N2) and out3.dtype == jnp.bfloat16
    assert jnp.allclose(out3.astype(jnp.float32), ref2, atol=1e-1, rtol=5e-2), \
        "general-path bf16 mismatch"

    print("KERNEL_OK")
</pallas_src>

<mosaic_0001>
module attributes {stable_mosaic.version = 11 : i64} {
  func.func @_linear_relu_small_kernel(%arg0: i32, %arg1: memref<8x128xf32, #tpu.memory_space<vmem>>, %arg2: memref<128x128xf32, #tpu.memory_space<vmem>>, %arg3: memref<1x128xf32, #tpu.memory_space<vmem>>, %arg4: memref<8x128xf32, #tpu.memory_space<vmem>>) attributes {dimension_semantics = [#tpu.dimension_semantics<parallel>], iteration_bounds = array<i64: 1>, scalar_prefetch = 0 : i64, scratch_operands = 0 : i64, tpu.core_type = #tpu.core_type<tc>, window_params = [{transform_indices = @transform_0, window_bounds = array<i64: 8, 128>}, {pipeline_mode = #tpu.pipeline_mode<synchronous>, transform_indices = @transform_1, window_bounds = array<i64: 128, 128>}, {pipeline_mode = #tpu.pipeline_mode<synchronous>, transform_indices = @transform_2, window_bounds = array<i64: 1, 128>}, {transform_indices = @transform_3, window_bounds = array<i64: 8, 128>}]} {
    %c0 = arith.constant 0 : index
    %c0_0 = arith.constant 0 : index
    %0 = vector.load %arg1[%c0, %c0_0] : memref<8x128xf32, #tpu.memory_space<vmem>>, vector<8x128xf32>
    %c0_1 = arith.constant 0 : index
    %c0_2 = arith.constant 0 : index
    %1 = vector.load %arg2[%c0_1, %c0_2] : memref<128x128xf32, #tpu.memory_space<vmem>>, vector<128x128xf32>
    %cst = arith.constant dense<0.000000e+00> : vector<8x128xf32>
    %2 = tpu.matmul %0, %1, %cst {dimension_numbers = #tpu.dot_dimension_numbers<[1], [0], [0], [1], [0, 0, 1, 1], [], []>} : vector<8x128xf32>, vector<128x128xf32>, vector<8x128xf32> -> vector<8x128xf32>
    %c0_3 = arith.constant 0 : index
    %c0_4 = arith.constant 0 : index
    %3 = vector.load %arg3[%c0_3, %c0_4] : memref<1x128xf32, #tpu.memory_space<vmem>>, vector<1x128xf32>
    %4 = vector.broadcast %3 : vector<1x128xf32> to vector<8x128xf32>
    %5 = arith.addf %2, %4 : vector<8x128xf32>
    %cst_5 = arith.constant 0.000000e+00 : f32
    %6 = vector.broadcast %cst_5 : f32 to vector<8x128xf32>
    %7 = arith.maximumf %5, %6 : vector<8x128xf32>
    %c0_6 = arith.constant 0 : index
    %c0_7 = arith.constant 0 : index
    %8 = vector.load %arg4[%c0_6, %c0_7] : memref<8x128xf32, #tpu.memory_space<vmem>>, vector<8x128xf32>
    tpu.vector_store %arg4[%c0_6, %c0_7], %7 {strides = array<i32>} : memref<8x128xf32, #tpu.memory_space<vmem>>, vector<8x128xf32>,
    return
  }
  func.func @transform_0(%arg0: i32) -> (i32, i32) {
    %c0_i32 = arith.constant 0 : i32
    %c0_i32_0 = arith.constant 0 : i32
    return %arg0, %c0_i32 : i32, i32
  }
  func.func @transform_1(%arg0: i32) -> (i32, i32) {
    %c0_i32 = arith.constant 0 : i32
    %c0_i32_0 = arith.constant 0 : i32
    %c0_i32_1 = arith.constant 0 : i32
    return %c0_i32, %c0_i32_0 : i32, i32
  }
  func.func @transform_2(%arg0: i32) -> (i32, i32) {
    %c0_i32 = arith.constant 0 : i32
    %c0_i32_0 = arith.constant 0 : i32
    %c0_i32_1 = arith.constant 0 : i32
    return %c0_i32, %c0_i32_0 : i32, i32
  }
  func.func @transform_3(%arg0: i32) -> (i32, i32) {
    %c0_i32 = arith.constant 0 : i32
    %c0_i32_0 = arith.constant 0 : i32
    return %arg0, %c0_i32 : i32, i32
  }
}

</mosaic_0001>

<bundles_post_ra>
// kernel: tpu_custom_call.1
= control target key start
LH: loop header
LB: loop body
LE: loop exit
PB: predicated region body
PF: predicated region fallthrough
CT: control target
= control target key end

     0   :  { %8 = vsyncpa [#allocation3], 0  ;;  %s227_s0 = inlined_call_operand.hbm [shape: f32[8,128], index: 0, kind: input, shape index: {}]   ;;  %s228_s1 = inlined_call_operand.hbm [shape: f32[128,128], index: 1, kind: input, shape index: {}]   ;;  %s229_s2 = inlined_call_operand.vmem [shape: f32[1,128], index: 2, kind: input, shape index: {}]   ;;  %s230_s3 = inlined_call_operand.hbm [shape: f32[8,128], index: 3, kind: output, shape index: {}]  }
   0x1   :  { %9 = vsyncpa [#allocation6], 0 }
   0x2   :  { %10 = vsyncpa [#allocation4], 0  ;;  %s16_s14 = sshll.u32 %s227_s0, 4  ;;  %s190_s15 = smov [#allocation2]   ;;  %s17_s14 = int_to_ptr.hbm [resolvable:$true] %s16_s14 }
   0x3   :  { %s18_s16 = sshll.u32 %s190_s15, 4  ;;  %s26_s19 = sshll.u32 %s228_s1, 4  ;;  %s19_s16 = int_to_ptr.vmem [resolvable:$true] %s18_s16  ;;  %s27_s19 = int_to_ptr.hbm [resolvable:$true] %s26_s19 }
   0x4   :  { %21 = dma.hbm_to_vmem [thread:$0]  %s17_s14, 128, %s19_s16, [#allocation3]  }
   0x5   :  { %s191_s20 = smov [#allocation5]   ;;  %s192_s22 = smov 128  }
   0x6   :  { %s28_s21 = sshll.u32 %s191_s20, 4  ;;  %s193_s23 = smov 8   ;;  %s29_s21 = int_to_ptr.vmem [resolvable:$true] %s28_s21 }
   0x7   :  { %34 = dma.hbm_to_vmem [thread:$0]  %s27_s19, 2048, %s29_s21, [#allocation6], %s192_s22, %s192_s22, %s193_s23  }
   0x8   :  { %184 = dma.done.wait [#allocation3], 128  }
   0x9   :  { %185 = vsyncadd [#allocation3], 4294967168 }
   0xa   :  { %186 = dma.done.wait [#allocation6], 2048  }
   0xb   :  { %187 = vsyncadd [#allocation6], 4294965248  ;;  %v61_v0 = vld [vmem:[#allocation5 + $0x78] sm:$0xff]  ;;  %v60_v1 = vld [vmem:[#allocation5 + $0x70] sm:$0xff]  ;;  %s194_s24 = smov [#allocation7]   ;;  %s95_s28 = sshll.u32 %s230_s3, 4  ;;  %s96_s28 = int_to_ptr.hbm [resolvable:$true] %s95_s28 }
   0xc   :  { %66 = vmatpush.msra.mxu0 %v61_v0  ;;  %v59_v2 = vld [vmem:[#allocation5 + $0x68] sm:$0xff]  ;;  %v58_v3 = vld [vmem:[#allocation5 + $0x60] sm:$0xff]  ;;  %v57_v4 = vld [vmem:[#allocation5 + $0x58] sm:$0xff]  ;;  %s93_s25 = sshll.u32 %s194_s24, 4  ;;  %s94_s25 = int_to_ptr.vmem [resolvable:$true] %s93_s25 }
   0xd   :  { %v56_v5 = vld [vmem:[#allocation5 + $0x50] sm:$0xff]  ;;  %v55_v6 = vld [vmem:[#allocation5 + $0x48] sm:$0xff]  ;;  %v54_v7 = vld [vmem:[#allocation5 + $0x40] sm:$0xff] }
   0xe   :  { %67 = vmatpush.msra.mxu0 %v60_v1  ;;  %v53_v8 = vld [vmem:[#allocation5 + $0x38] sm:$0xff]  ;;  %v52_v9 = vld [vmem:[#allocation5 + $0x30] sm:$0xff]  ;;  %v51_v10 = vld [vmem:[#allocation5 + $0x28] sm:$0xff] }
   0xf   :  { %v50_v11 = vld [vmem:[#allocation5 + $0x20] sm:$0xff]  ;;  %v49_v12 = vld [vmem:[#allocation5 + $0x18] sm:$0xff]  ;;  %v48_v13 = vld [vmem:[#allocation5 + $0x10] sm:$0xff] }
  0x10   :  { %68 = vmatpush.msra.mxu0 %v59_v2  ;;  %v47_v14 = vld [vmem:[#allocation5 + $0x8] sm:$0xff]  ;;  %v46_v15 = vld [vmem:[#allocation5] sm:$0xff]  ;;  %v45_v16 = vld [vmem:[#allocation2] sm:$0xff] }
  0x11   :  { %v111_v17 = vld [vmem:[%s229_s2] ss:$0 sm:$0xff] }
  0x12   :  { %69 = vmatpush.msra.mxu0 %v58_v3 }
  0x14   :  { %70 = vmatpush.msra.mxu0 %v57_v4 }
  0x16   :  { %71 = vmatpush.msra.mxu0 %v56_v5 }
  0x18   :  { %72 = vmatpush.msra.mxu0 %v55_v6 }
  0x1a   :  { %73 = vmatpush.msra.mxu0 %v54_v7 }
  0x1c   :  { %74 = vmatpush.msra.mxu0 %v53_v8 }
  0x1e   :  { %75 = vmatpush.msra.mxu0 %v52_v9 }
  0x20   :  { %76 = vmatpush.msra.mxu0 %v51_v10 }
  0x22   :  { %77 = vmatpush.msra.mxu0 %v50_v11 }
  0x24   :  { %78 = vmatpush.msra.mxu0 %v49_v12 }
  0x26   :  { %79 = vmatpush.msra.mxu0 %v48_v13 }
  0x28   :  { %80 = vmatpush.msra.mxu0 %v47_v14 }
  0x2a   :  { %81 = vmatpush.msra.mxu0 %v46_v15 }
  0x2b   :  { %82 = vmatmul.f32.vlgmr.msra.gmra.mxu0 %v45_v16 }
  0xa8   :  { %v83_v18 = vpop.f32.mrf.mxu0 }
  0xa9   :  { %v84_v19 = vadd.f32 %v111_v17, %v83_v18 }
  0xab   :  { %v86_v20 = vmax.f32 %v84_v19, 0.0 }
  0xad   :  { %87 = vst [vmem:[#allocation7] sm:$0xff] %v86_v20 }
  0xae   :  { %98 = dma.vmem_to_hbm [thread:$0]  %s94_s25, 128, %s96_s28, [#allocation4]  }
  0xaf   :  { %188 = dma.done.wait [#allocation4], 128  }
  0xb0   :  { %189 = vsyncadd [#allocation4], 4294967168 }
  0xb1   :  { %103 = vsyncpa [#allocation3], 1 }
  0xb2   :  { %104 = vsyncpa [#allocation6], 1 }
  0xb3   :  { %105 = vsyncpa [#allocation4], 1 }

</bundles_post_ra>
